<compile_context>
chip_gen: v5e
topology: v5e:2x2
jax: 0.10.0
libtpu: 0.0.40
codegen_flags: <defaults>
</compile_context>

<pallas_src>
import functools

import jax
import jax.numpy as jnp
from jax import lax
from jax.experimental import pallas as pl
from jax.experimental.pallas import tpu as pltpu

THETA = 1.5


def _softplus(x):
    # log(1 + exp(x)) without overflow; exp argument is always <= 0.
    return jnp.maximum(x, 0.0) + jnp.log(1.0 + jnp.exp(-jnp.abs(x)))


def _loss_kernel(ps_ref, ns_ref, o_ref, acc_ref, *, logical_b, logical_d,
                 theta, tb, tiles_per_core):
    c = pl.program_id(0)   # per-core partial axis ("parallel")
    i = pl.program_id(1)   # batch-tile axis ("arbitrary" -> resident acc)

    @pl.when(i == 0)
    def _():
        acc_ref[...] = jnp.zeros_like(acc_ref)
        o_ref[...] = jnp.zeros_like(o_ref)

    ps = ps_ref[...].astype(jnp.float32)   # (tb, D): full feature dim, no pad
    ns = ns_ref[...].astype(jnp.float32)

    inv_d = jnp.float32(1.0 / logical_d)
    ps_ms = jnp.sum(ps * ps, axis=1, keepdims=True) * inv_d   # (tb, 1)
    ns_ms = jnp.sum(ns * ns, axis=1, keepdims=True) * inv_d   # (tb, 1)

    ploss = _softplus(theta - ps_ms)
    nloss = _softplus(ns_ms - theta)

    # Mask rows past the logical batch: covers the ragged last block and any
    # fully-out-of-range grid step whose index_map was clamped back to the
    # last valid block (those contribute exactly zero).
    row0 = (c * tiles_per_core + i) * tb
    rows = row0 + lax.broadcasted_iota(jnp.int32, (tb, 1), 0)
    per_row = jnp.where(rows < logical_b, ploss + nloss, 0.0)

    # Defer the sublane collapse to the end: per-step this is a plain VPU add
    # into a resident VMEM scratch (no loop-carried XLU reduce / narrow store).
    acc_ref[...] += per_row

    @pl.when(i == pl.num_programs(1) - 1)
    def _():
        o_ref[...] = (jnp.sum(acc_ref[...], axis=0, keepdims=True)
                      * jnp.float32(1.0 / logical_b))


def _tpu_config():
    """Best-effort detection of VMEM capacity and 2-TensorCore chips."""
    vmem_cap = 64 * 1024 * 1024          # conservative default (v7x per-TC)
    two_tc = False
    try:
        cap = getattr(pltpu.get_tpu_info(), "vmem_capacity_bytes", None)
        if cap:
            vmem_cap = int(cap)
    except Exception:
        pass
    try:
        kind = jax.devices()[0].device_kind.lower()
        two_tc = ("v7" in kind) or ("tpu7" in kind)
    except Exception:
        pass
    return vmem_cap, two_tc


def loss_pallas(ps, ns, theta=THETA):
    B, D = ps.shape
    assert ns.shape == (B, D)

    itemsize = jnp.dtype(ps.dtype).itemsize
    vmem_cap, two_tc = _tpu_config()

    # Sublane multiple: 8 rows/vreg at 32-bit, 16 at 16-bit, 32 at 8-bit.
    row_mult = 8 * max(1, 4 // itemsize)

    # Per-input per-step tile bytes: big enough to amortize the per-grid-step
    # overhead, small enough that 2 inputs x 2 pipeline buffers plus in-kernel
    # temporaries fit this generation's VMEM with headroom.
    tile_bytes = max(2 * 1024 * 1024, min(8 * 1024 * 1024, vmem_cap // 16))
    # Cap rows so lane-sparse (tb, 1) per-row temporaries stay small.
    row_cap = 8192

    tb = max(row_mult, tile_bytes // max(1, D * itemsize))
    tb = min(tb, row_cap)
    tb = max(row_mult, (tb // row_mult) * row_mult)
    if B <= row_mult:
        tb = B                                  # full-extent block is legal
    else:
        tb = min(tb, (B // row_mult) * row_mult)  # never exceed the array

    n_blocks = pl.cdiv(B, tb)
    # 2-way core split only on 2-TensorCore chips; serial loop elsewhere.
    n_cores = 2 if (two_tc and n_blocks >= 2) else 1
    tiles_per_core = pl.cdiv(n_blocks, n_cores)

    kernel = functools.partial(
        _loss_kernel, logical_b=B, logical_d=D, theta=float(theta), tb=tb,
        tiles_per_core=tiles_per_core)

    def in_map(c, i):
        blk = c * tiles_per_core + i
        # Clamp so no grid step maps to a block entirely past B; such steps
        # re-read the last valid block and the row mask zeroes their output.
        return (jnp.minimum(blk, n_blocks - 1), 0)

    # TODO(synk): on v7x, verify the "parallel" core axis really shards across
    # both TensorCores; if not, drive it with pltpu.CORE_PARALLEL.
    partials = pl.pallas_call(
        kernel,
        out_shape=jax.ShapeDtypeStruct((n_cores, 1, 1), jnp.float32),
        grid=(n_cores, tiles_per_core),
        in_specs=[
            pl.BlockSpec((tb, D), in_map),   # full-D last dim: no lane padding
            pl.BlockSpec((tb, D), in_map),
        ],
        # Leading core axis is squeezed; each core owns a (1, 1) scalar block.
        out_specs=pl.BlockSpec((None, 1, 1), lambda c, i: (c, 0, 0)),
        scratch_shapes=[pltpu.VMEM((tb, 1), jnp.float32)],
        compiler_params=pltpu.CompilerParams(
            dimension_semantics=("parallel", "arbitrary"),
            vmem_limit_bytes=int((vmem_cap * 7) // 8)),
    )(ps, ns)
    # Each per-core partial is already divided by the logical batch size.
    return jnp.sum(partials)


def loss_ref(ps, ns, theta=THETA):
    # Literal port of the PyTorch module.
    ps_ms = jnp.mean(ps.astype(jnp.float32) ** 2, axis=1)
    ns_ms = jnp.mean(ns.astype(jnp.float32) ** 2, axis=1)
    ploss = jnp.mean(jnp.log(1.0 + jnp.exp(-ps_ms + theta)))
    nloss = jnp.mean(jnp.log(1.0 + jnp.exp(ns_ms - theta)))
    return ploss + nloss


if __name__ == "__main__":
    key = jax.random.PRNGKey(0)
    kp, kn = jax.random.split(key)
    B, D = 8, 32
    ps = jax.random.normal(kp, (B, D), dtype=jnp.float32)
    ns = jax.random.normal(kn, (B, D), dtype=jnp.float32) * 0.5

    out = loss_pallas(ps, ns)
    jax.block_until_ready(out)

    ref = loss_ref(ps, ns)
    assert jnp.allclose(out, ref, rtol=1e-5, atol=1e-5), (out, ref)
    print("KERNEL_OK")
</pallas_src>

<mosaic_0001>
module attributes {stable_mosaic.version = 11 : i64} {
  func.func @_loss_kernel(%arg0: i32, %arg1: i32, %arg2: memref<8x32xf32, #tpu.memory_space<vmem>>, %arg3: memref<8x32xf32, #tpu.memory_space<vmem>>, %arg4: memref<1x1x1xf32, #tpu.memory_space<vmem>>, %arg5: memref<8x1xf32, #tpu.memory_space<vmem>>) attributes {dimension_semantics = [#tpu.dimension_semantics<parallel>, #tpu.dimension_semantics<arbitrary>], iteration_bounds = array<i64: 1, 1>, scalar_prefetch = 0 : i64, scratch_operands = 1 : i64, tpu.core_type = #tpu.core_type<tc>, window_params = [{transform_indices = @transform_0, window_bounds = array<i64: 8, 32>}, {transform_indices = @transform_1, window_bounds = array<i64: 8, 32>}, {transform_indices = @transform_2, window_bounds = array<i64: 1, 1, 1>}]} {
    %c0_i32 = arith.constant 0 : i32
    %0 = arith.cmpi eq, %arg1, %c0_i32 : i32
    %1 = arith.extui %0 : i1 to i32
    %c0_i32_0 = arith.constant 0 : i32
    %2 = arith.cmpi ne, %1, %c0_i32_0 : i32
    scf.if %2 {
      %cst_23 = arith.constant 0.000000e+00 : f32
      %56 = vector.broadcast %cst_23 : f32 to vector<8x1xf32>
      %c0_24 = arith.constant 0 : index
      %c0_25 = arith.constant 0 : index
      %57 = vector.load %arg5[%c0_24, %c0_25] : memref<8x1xf32, #tpu.memory_space<vmem>>, vector<8x1xf32>
      tpu.vector_store %arg5[%c0_24, %c0_25], %56 {strides = array<i32>} : memref<8x1xf32, #tpu.memory_space<vmem>>, vector<8x1xf32>,
      %cst_26 = arith.constant 0.000000e+00 : f32
      %58 = vector.broadcast %cst_26 : f32 to vector<1x1xf32>
      %c0_27 = arith.constant 0 : index
      %c0_28 = arith.constant 0 : index
      %c0_29 = arith.constant 0 : index
      %59 = vector.load %arg4[%c0_27, %c0_28, %c0_29] : memref<1x1x1xf32, #tpu.memory_space<vmem>>, vector<1x1x1xf32>
      %60 = vector.shape_cast %59 : vector<1x1x1xf32> to vector<1x1xf32>
      %61 = vector.shape_cast %58 : vector<1x1xf32> to vector<1x1x1xf32>
      tpu.vector_store %arg4[%c0_27, %c0_28, %c0_29], %61 {strides = array<i32>} : memref<1x1x1xf32, #tpu.memory_space<vmem>>, vector<1x1x1xf32>,
    } else {
    }
    %c0 = arith.constant 0 : index
    %c0_1 = arith.constant 0 : index
    %3 = vector.load %arg2[%c0, %c0_1] : memref<8x32xf32, #tpu.memory_space<vmem>>, vector<8x32xf32>
    %c0_2 = arith.constant 0 : index
    %c0_3 = arith.constant 0 : index
    %4 = vector.load %arg3[%c0_2, %c0_3] : memref<8x32xf32, #tpu.memory_space<vmem>>, vector<8x32xf32>
    %5 = arith.mulf %3, %3 : vector<8x32xf32>
    %cst = arith.constant dense<0.000000e+00> : vector<8xf32>
    %6 = vector.multi_reduction <add>, %5, %cst [1] : vector<8x32xf32> to vector<8xf32>
    %7 = vector.shape_cast %6 : vector<8xf32> to vector<8x1xf32>
    %cst_4 = arith.constant 3.125000e-02 : f32
    %8 = vector.broadcast %cst_4 : f32 to vector<8x1xf32>
    %9 = arith.mulf %7, %8 : vector<8x1xf32>
    %10 = arith.mulf %4, %4 : vector<8x32xf32>
    %cst_5 = arith.constant dense<0.000000e+00> : vector<8xf32>
    %11 = vector.multi_reduction <add>, %10, %cst_5 [1] : vector<8x32xf32> to vector<8xf32>
    %12 = vector.shape_cast %11 : vector<8xf32> to vector<8x1xf32>
    %cst_6 = arith.constant 3.125000e-02 : f32
    %13 = vector.broadcast %cst_6 : f32 to vector<8x1xf32>
    %14 = arith.mulf %12, %13 : vector<8x1xf32>
    %cst_7 = arith.constant 1.500000e+00 : f32
    %15 = vector.broadcast %cst_7 : f32 to vector<8x1xf32>
    %16 = arith.subf %15, %9 : vector<8x1xf32>
    %cst_8 = arith.constant 0.000000e+00 : f32
    %17 = vector.broadcast %cst_8 : f32 to vector<8x1xf32>
    %18 = arith.maximumf %16, %17 : vector<8x1xf32>
    %19 = math.absf %16 : vector<8x1xf32>
    %cst_9 = arith.constant 0.000000e+00 : f32
    %20 = vector.broadcast %cst_9 : f32 to vector<8x1xf32>
    %21 = arith.subf %20, %19 : vector<8x1xf32>
    %22 = math.exp %21 : vector<8x1xf32>
    %cst_10 = arith.constant 1.000000e+00 : f32
    %23 = vector.broadcast %cst_10 : f32 to vector<8x1xf32>
    %24 = arith.addf %23, %22 : vector<8x1xf32>
    %25 = math.log %24 : vector<8x1xf32>
    %26 = arith.addf %18, %25 : vector<8x1xf32>
    %cst_11 = arith.constant 1.500000e+00 : f32
    %27 = vector.broadcast %cst_11 : f32 to vector<8x1xf32>
    %28 = arith.subf %14, %27 : vector<8x1xf32>
    %cst_12 = arith.constant 0.000000e+00 : f32
    %29 = vector.broadcast %cst_12 : f32 to vector<8x1xf32>
    %30 = arith.maximumf %28, %29 : vector<8x1xf32>
    %31 = math.absf %28 : vector<8x1xf32>
    %cst_13 = arith.constant 0.000000e+00 : f32
    %32 = vector.broadcast %cst_13 : f32 to vector<8x1xf32>
    %33 = arith.subf %32, %31 : vector<8x1xf32>
    %34 = math.exp %33 : vector<8x1xf32>
    %cst_14 = arith.constant 1.000000e+00 : f32
    %35 = vector.broadcast %cst_14 : f32 to vector<8x1xf32>
    %36 = arith.addf %35, %34 : vector<8x1xf32>
    %37 = math.log %36 : vector<8x1xf32>
    %38 = arith.addf %30, %37 : vector<8x1xf32>
    %c1_i32 = arith.constant 1 : i32
    %39 = arith.muli %arg0, %c1_i32 : i32
    %40 = arith.addi %39, %arg1 : i32
    %c8_i32 = arith.constant 8 : i32
    %41 = arith.muli %40, %c8_i32 : i32
    %42 = tpu.iota {dimensions = array<i32: 0>} : vector<8x1xi32>
    %43 = vector.broadcast %41 : i32 to vector<8x1xi32>
    %44 = arith.addi %43, %42 : vector<8x1xi32>
    %c8_i32_15 = arith.constant 8 : i32
    %45 = vector.broadcast %c8_i32_15 : i32 to vector<8x1xi32>
    %46 = arith.cmpi slt, %44, %45 : vector<8x1xi32>
    %47 = arith.addf %26, %38 : vector<8x1xf32>
    %cst_16 = arith.constant 0.000000e+00 : f32
    %48 = vector.broadcast %cst_16 : f32 to vector<8x1xf32>
    %49 = arith.select %46, %47, %48 : vector<8x1xi1>, vector<8x1xf32>
    %c0_17 = arith.constant 0 : index
    %c0_18 = arith.constant 0 : index
    %50 = vector.load %arg5[%c0_17, %c0_18] : memref<8x1xf32, #tpu.memory_space<vmem>>, vector<8x1xf32>
    %51 = arith.addf %50, %49 : vector<8x1xf32>
    %c0_19 = arith.constant 0 : index
    %c0_20 = arith.constant 0 : index
    %52 = vector.load %arg5[%c0_19, %c0_20] : memref<8x1xf32, #tpu.memory_space<vmem>>, vector<8x1xf32>
    tpu.vector_store %arg5[%c0_19, %c0_20], %51 {strides = array<i32>} : memref<8x1xf32, #tpu.memory_space<vmem>>, vector<8x1xf32>,
    %c0_i32_21 = arith.constant 0 : i32
    %53 = arith.cmpi eq, %arg1, %c0_i32_21 : i32
    %54 = arith.extui %53 : i1 to i32
    %c0_i32_22 = arith.constant 0 : i32
    %55 = arith.cmpi ne, %54, %c0_i32_22 : i32
    scf.if %55 {
      %c0_23 = arith.constant 0 : index
      %c0_24 = arith.constant 0 : index
      %56 = vector.load %arg5[%c0_23, %c0_24] : memref<8x1xf32, #tpu.memory_space<vmem>>, vector<8x1xf32>
      %cst_25 = arith.constant dense<0.000000e+00> : vector<1xf32>
      %57 = vector.multi_reduction <add>, %56, %cst_25 [0] : vector<8x1xf32> to vector<1xf32>
      %58 = vector.shape_cast %57 : vector<1xf32> to vector<1x1xf32>
      %cst_26 = arith.constant 1.250000e-01 : f32
      %59 = vector.broadcast %cst_26 : f32 to vector<1x1xf32>
      %60 = arith.mulf %58, %59 : vector<1x1xf32>
      %c0_27 = arith.constant 0 : index
      %c0_28 = arith.constant 0 : index
      %c0_29 = arith.constant 0 : index
      %61 = vector.load %arg4[%c0_27, %c0_28, %c0_29] : memref<1x1x1xf32, #tpu.memory_space<vmem>>, vector<1x1x1xf32>
      %62 = vector.shape_cast %61 : vector<1x1x1xf32> to vector<1x1xf32>
      %63 = vector.shape_cast %60 : vector<1x1xf32> to vector<1x1x1xf32>
      tpu.vector_store %arg4[%c0_27, %c0_28, %c0_29], %63 {strides = array<i32>} : memref<1x1x1xf32, #tpu.memory_space<vmem>>, vector<1x1x1xf32>,
    } else {
    }
    return
  }
  func.func @transform_0(%arg0: i32, %arg1: i32) -> (i32, i32) {
    %c1_i32 = arith.constant 1 : i32
    %0 = arith.muli %arg0, %c1_i32 : i32
    %1 = arith.addi %0, %arg1 : i32
    %c0_i32 = arith.constant 0 : i32
    %2 = arith.minsi %1, %c0_i32 : i32
    %c0_i32_0 = arith.constant 0 : i32
    %c0_i32_1 = arith.constant 0 : i32
    return %2, %c0_i32_0 : i32, i32
  }
  func.func @transform_1(%arg0: i32, %arg1: i32) -> (i32, i32) {
    %c1_i32 = arith.constant 1 : i32
    %0 = arith.muli %arg0, %c1_i32 : i32
    %1 = arith.addi %0, %arg1 : i32
    %c0_i32 = arith.constant 0 : i32
    %2 = arith.minsi %1, %c0_i32 : i32
    %c0_i32_0 = arith.constant 0 : i32
    %c0_i32_1 = arith.constant 0 : i32
    return %2, %c0_i32_0 : i32, i32
  }
  func.func @transform_2(%arg0: i32, %arg1: i32) -> (i32, i32, i32) {
    %c0_i32 = arith.constant 0 : i32
    %c0_i32_0 = arith.constant 0 : i32
    %c0_i32_1 = arith.constant 0 : i32
    return %arg0, %c0_i32, %c0_i32_0 : i32, i32, i32
  }
}

</mosaic_0001>

<bundles_post_ra>
// kernel: tpu_custom_call.1
= control target key start
LH: loop header
LB: loop body
LE: loop exit
PB: predicated region body
PF: predicated region fallthrough
CT: control target
= control target key end

     0   :  { %7 = vsyncpa [#allocation4], 0  ;;  %s270_s0 = inlined_call_operand.hbm [shape: f32[8,32], index: 0, kind: input, shape index: {}]   ;;  %s271_s1 = inlined_call_operand.hbm [shape: f32[8,32], index: 1, kind: input, shape index: {}]   ;;  %s272_s2 = inlined_call_operand.hbm [shape: f32[1,1,1], index: 2, kind: output, shape index: {}]  }
   0x1   :  { %8 = vsyncpa [#allocation7], 0 }
   0x2   :  { %9 = vsyncpa [#allocation5], 0  ;;  %s20_s11 = sshll.u32 %s270_s0, 4  ;;  %s237_s12 = smov [#allocation3]   ;;  %s21_s11 = int_to_ptr.hbm [resolvable:$true] %s20_s11 }
   0x3   :  { %s22_s13 = sshll.u32 %s237_s12, 4  ;;  %s36_s16 = sshll.u32 %s271_s1, 4  ;;  %s23_s13 = int_to_ptr.vmem [resolvable:$true] %s22_s13  ;;  %s37_s16 = int_to_ptr.hbm [resolvable:$true] %s36_s16 }
   0x4   :  { %25 = dma.hbm_to_vmem [thread:$0]  %s21_s11, 128, %s23_s13, [#allocation4]  }
   0x5   :  { %s238_s17 = smov [#allocation6]  }
   0x6   :  { %s38_s18 = sshll.u32 %s238_s17, 4  ;;  %s39_s18 = int_to_ptr.vmem [resolvable:$true] %s38_s18 }
   0x7   :  { %41 = dma.hbm_to_vmem [thread:$0]  %s37_s16, 128, %s39_s18, [#allocation7]  }
   0x8   :  { %231 = dma.done.wait [#allocation4], 128  }
   0x9   :  { %232 = vsyncadd [#allocation4], 4294967168 }
   0xa   :  { %233 = dma.done.wait [#allocation7], 128  }
   0xb   :  { %234 = vsyncadd [#allocation7], 4294967168  ;;  %v64_v0 = vld [vmem:[#allocation3] sm:$0xff]  ;;  %vm67_vm0 = vcmask 261120   ;;  %v65_v2 = vld [vmem:[#allocation6] sm:$0xff]  ;;  %vm60_vm1 = vcmask 7168  }
   0xc   :  { %v66_v1 = vmul.f32 %v64_v0, %v64_v0  ;;  %v72_v4 = vmul.f32 %v65_v2, %v65_v2  ;;  %v239_v6 = vmov 0.0   ;;  %vm62_vm2 = vcmask 0   ;;  %s240_s0 = smov [#allocation8]   ;;  %s131_s21 = sshll.u32 %s272_s2, 4  ;;  %s132_s21 = int_to_ptr.hbm [resolvable:$true] %s131_s21 }
   0xd   :  { %61 = vst.msk [vmem:[#allocation2] sm:$0xff] %vm60_vm1, %v239_v6  ;;  %s129_s1 = sshll.u32 %s240_s0, 4  ;;  %s130_s1 = int_to_ptr.vmem [resolvable:$true] %s129_s1 }
   0xe   :  { %v68_v3 = vsel %vm67_vm0, %v66_v1, 0.0  ;;  %v73_v5 = vsel %vm67_vm0, %v72_v4, 0.0  ;;  %63 = vst.msk [vmem:[#allocation8] sm:$0x1] %vm62_vm2, %v239_v6 }
   0xf   :  { %69 = vadd.xlane.f32.xlu0 %v68_v3 }
  0x14   :  { %v106_v31 = vld [vmem:[#allocation2] sm:$0xff] }
  0x17   :  { %74 = vadd.xlane.f32.xlu0 %v73_v5 }
  0x82   :  { %v70_v7 = vpop.xlane.xlu0 %69 }
  0x83   :  { %v71_v8 = vmul.f32 0.03125, %v70_v7 }
  0x85   :  { %v77_v9 = vsub.f32 1.5, %v71_v8 }
  0x87   :  { %v79_v10 = vand.u32 2147483647, %v77_v9  ;;  %v78_v26 = vmax.f32 %v77_v9, 0.0 }
  0x89   :  { %v80_v11 = vsub.f32 0.0, %v79_v10 }
  0x8a   :  { %v75_v12 = vpop.xlane.xlu0 %74 }
  0x8b   :  { %v81_v13 = vmul.f32 1.442695, %v80_v11  ;;  %v76_v14 = vmul.f32 0.03125, %v75_v12 }
  0x8d   :  { %151 = vpow2.f32 %v81_v13  ;;  %v146_v15 = vadd.f32 -1.5, %v76_v14 }
  0x8f   :  { %v89_v16 = vand.u32 2147483647, %v146_v15  ;;  %v88_v27 = vmax.f32 %v146_v15, 0.0 }
  0x91   :  { %v90_v17 = vsub.f32 0.0, %v89_v16 }
  0x93   :  { %v152_v18 = vpop.eup %151  ;;  %v91_v19 = vmul.f32 1.442695, %v90_v17 }
  0x94   :  { %v83_v20 = vadd.f32 1.0, %v152_v18 }
  0x95   :  { %153 = vpow2.f32 %v91_v19 }
  0x96   :  { %155 = vlog2.f32 %v83_v20 }
  0x9b   :  { %v154_v21 = vpop.eup %153 }
  0x9c   :  { %v93_v22 = vadd.f32 1.0, %v154_v21  ;;  %v156_v23 = vpop.eup %155 }
  0x9d   :  { %v85_v24 = vmul.f32 0.6931472, %v156_v23 }
  0x9e   :  { %157 = vlog2.f32 %v93_v22 }
  0x9f   :  { %v86_v29 = vadd.f32 %v85_v24, %v78_v26 }
  0xa4   :  { %v158_v25 = vpop.eup %157 }
  0xa5   :  { %v95_v28 = vmul.f32 0.6931472, %v158_v25 }
  0xa7   :  { %v96_v30 = vadd.f32 %v95_v28, %v88_v27 }
  0xa9   :  { %v104_v32 = vadd.f32 %v96_v30, %v86_v29 }
  0xab   :  { %v107_v33 = vadd.f32 %v106_v31, %v104_v32 }
  0xad   :  { %109 = vst.msk [vmem:[#allocation2] sm:$0xff] %vm60_vm1, %v107_v33 }
  0xb4   :  { %v113_v34 = vld [vmem:[#allocation2] sm:$0xff] }
  0xb5   :  { %v114_v35 = vsel %vm60_vm1, %v113_v34, 0.0 }
  0xb6   :  { %v115_v36 = vrot.slane %v114_v35, 4 }
  0xb8   :  { %v116_v37 = vadd.f32 %v115_v36, %v114_v35 }
  0xba   :  { %v117_v38 = vrot.slane %v116_v37, 2 }
  0xbc   :  { %v118_v39 = vadd.f32 %v117_v38, %v116_v37 }
  0xbe   :  { %v119_v40 = vrot.slane %v118_v39, 1 }
  0xc0   :  { %v120_v41 = vadd.f32 %v119_v40, %v118_v39 }
  0xc2   :  { %v121_v42 = vmul.f32 0.125, %v120_v41 }
  0xc4   :  { %123 = vst.msk [vmem:[#allocation8] sm:$0x1] %vm62_vm2, %v121_v42 }
  0xc5   :  { %134 = dma.vmem_to_hbm [thread:$0]  %s130_s1, 16, %s132_s21, [#allocation5]  }
  0xc6   :  { %235 = dma.done.wait [#allocation5], 16  }
  0xc7   :  { %236 = vsyncadd [#allocation5], 4294967280 }
  0xc8   :  { %139 = vsyncpa [#allocation4], 1 }
  0xc9   :  { %140 = vsyncpa [#allocation7], 1 }
  0xca   :  { %141 = vsyncpa [#allocation5], 1 }

</bundles_post_ra>
